<compile_context>
chip_gen: v7x
topology: tpu7x:2x2x1
jax: 0.10.0
libtpu: 0.0.40
codegen_flags: <defaults>
</compile_context>

<pallas_src>
import functools
import math

import jax
import jax.numpy as jnp
from jax.experimental import pallas as pl
from jax.experimental.pallas import tpu as pltpu


def _posenc_kernel(d_ref, freq_ref, phase_ref, expand_ref, o_ref,
                   *, seq_neighbors):
    d = d_ref[...]                                     # (T, K) masked seq distance
    d = jnp.where(jnp.abs(d) > seq_neighbors, 0.0, d)  # d[|d| > s] = 0

    # Expand each neighbor distance across its D (lane-padded) output lanes:
    # (T, K) @ (K, KD_pad) against a 0/1 matrix -> exact copy on the MXU.
    d_exp = jnp.dot(d, expand_ref[...], preferred_element_type=jnp.float32)

    # One transcendental per lane: cos(x) = sin(x + pi/2).  phase is pi/2 on
    # the cos half of each D-chunk, 0 on the sin half and on padded lanes.
    angles = d_exp * freq_ref[...] + phase_ref[...]    # (T, KD_pad)
    val = jnp.sin(angles)
    val = jnp.where(d_exp != 0.0, val, 0.0)            # emask = (d != 0)
    o_ref[...] = val.astype(o_ref.dtype)


def _pick_tile_rows(rows, in_lanes, out_lanes, *,
                    vmem_budget_bytes=24 << 20, min_tiles=2):
    """Largest sublane-aligned row tile whose double-buffered in+out blocks
    (last dims lane-padded to 128) fit the VMEM budget, capped at
    ceil(rows / min_tiles) so the grid always has >= min_tiles steps and the
    'parallel' row axis can be split across v7x's two TensorCores."""
    lane = 128
    in_pad = pl.cdiv(in_lanes, lane) * lane
    out_pad = pl.cdiv(out_lanes, lane) * lane
    bytes_per_row = 2 * 4 * (in_pad + out_pad)         # double-buffered, f32
    t = max(1, vmem_budget_bytes // bytes_per_row)
    t = min(t, pl.cdiv(rows, min_tiles))               # guarantee >= 2 tiles
    if rows <= 8:
        return rows                                    # tiny input: one block
    return max(8, (t // 8) * 8)                        # sublane-aligned


def positional_encoding(E_idx, mask, *, pos_emb_dims, seq_neighbors,
                        out_dtype=jnp.float32):
    """Pallas equivalent of PositionalEncoding.forward(E_idx, mask)."""
    B, N, K = E_idx.shape
    D = pos_emb_dims
    assert D % 2 == 0, "pos_emb_dims must be even (cos/sin halves)"
    assert mask.shape == (B, N)
    half = D // 2
    KD = K * D
    KD_pad = pl.cdiv(KD, 128) * 128                    # lane-dense output stores
    rows = B * N

    # --- layout plumbing / constant prep (all tiny vs the (rows, K*D) output) ---
    # Fold ii-subtraction and the node mask into the single (rows, K) input.
    ii = jnp.arange(N, dtype=jnp.float32).reshape(1, N, 1)
    d0 = (E_idx.astype(jnp.float32) - ii) * mask.astype(jnp.float32)[:, :, None]
    d0 = d0.reshape(rows, K)

    freq = jnp.exp(jnp.arange(0, D, 2, dtype=jnp.float32)
                   * -(math.log(10000.0) / D))                      # (D/2,)
    freq_lane = jnp.tile(jnp.concatenate([freq, freq]), K)          # (K*D,)
    phase_lane = jnp.tile(
        jnp.concatenate([jnp.full((half,), jnp.pi / 2, jnp.float32),
                         jnp.zeros((half,), jnp.float32)]), K)      # (K*D,)
    expand_mat = jnp.kron(jnp.eye(K, dtype=jnp.float32),
                          jnp.ones((1, D), jnp.float32))            # (K, K*D)
    if KD_pad != KD:
        pad = KD_pad - KD
        freq_lane = jnp.pad(freq_lane, (0, pad))
        phase_lane = jnp.pad(phase_lane, (0, pad))
        expand_mat = jnp.pad(expand_mat, ((0, 0), (0, pad)))
    freq_lane = freq_lane.reshape(1, KD_pad)
    phase_lane = phase_lane.reshape(1, KD_pad)

    tile_rows = _pick_tile_rows(rows, K, KD_pad)
    grid = (pl.cdiv(rows, tile_rows),)                 # partial last block OK

    cost = pl.CostEstimate(
        flops=int(rows * (2 * K * KD_pad + 4 * KD_pad)),
        transcendentals=int(rows * KD_pad),
        bytes_accessed=int(4 * (rows * K + rows * KD_pad
                                + 2 * KD_pad + K * KD_pad)),
    )

    out = pl.pallas_call(
        functools.partial(_posenc_kernel, seq_neighbors=float(seq_neighbors)),
        out_shape=jax.ShapeDtypeStruct((rows, KD_pad), out_dtype),
        grid_spec=pltpu.PrefetchScalarGridSpec(
            num_scalar_prefetch=0,
            grid=grid,
            in_specs=[
                pl.BlockSpec((tile_rows, K), lambda i: (i, 0)),
                # grid-invariant constants (constant index_map; a few KiB)
                pl.BlockSpec((1, KD_pad), lambda i: (0, 0)),
                pl.BlockSpec((1, KD_pad), lambda i: (0, 0)),
                pl.BlockSpec((K, KD_pad), lambda i: (0, 0)),
            ],
            out_specs=pl.BlockSpec((tile_rows, KD_pad), lambda i: (i, 0)),
        ),
        compiler_params=pltpu.CompilerParams(
            dimension_semantics=("parallel",),   # v7x: shard row tiles over 2 TCs
            vmem_limit_bytes=32 * 1024 * 1024,
        ),
        cost_estimate=cost,
    )(d0, freq_lane, phase_lane, expand_mat)

    if KD_pad != KD:
        out = out[:, :KD]
    return out.reshape(B, N, K, D)


def _reference(E_idx, mask, pos_emb_dims, seq_neighbors):
    B, N, K = E_idx.shape
    ii = jnp.arange(N, dtype=jnp.float32).reshape(1, N, 1)
    d = (E_idx.astype(jnp.float32) - ii)[..., None]
    d = d * mask[:, :, None, None]
    d = jnp.where(jnp.abs(d) > seq_neighbors, 0.0, d)
    freq = jnp.exp(jnp.arange(0, pos_emb_dims, 2, dtype=jnp.float32)
                   * -(math.log(10000.0) / pos_emb_dims))
    angles = d * freq.reshape(1, 1, 1, -1)
    E = jnp.concatenate([jnp.cos(angles), jnp.sin(angles)], axis=-1)
    return E * (d != 0.0).astype(jnp.float32)


if __name__ == "__main__":
    # Small shapes consistent with the module:
    # batch=2, nodes(seq)=8, neighbors=16, pos_emb_dims(hidden)=16.
    B, N, K, D = 2, 8, 16, 16
    seq_neighbors = 4
    # period_range is unused in the PyTorch forward pass.

    key = jax.random.PRNGKey(0)
    k1, k2 = jax.random.split(key)
    E_idx = jax.random.randint(k1, (B, N, K), 0, N).astype(jnp.int32)
    mask = (jax.random.uniform(k2, (B, N)) > 0.3).astype(jnp.float32)

    out = positional_encoding(E_idx, mask, pos_emb_dims=D,
                              seq_neighbors=seq_neighbors)
    out = jax.block_until_ready(out)

    ref = _reference(E_idx, mask, D, seq_neighbors)
    assert out.shape == (B, N, K, D) and out.dtype == jnp.float32
    assert jnp.max(jnp.abs(out - ref)) < 1e-5, "mismatch vs reference"

    print("KERNEL_OK")
</pallas_src>

<mosaic_0001>
module attributes {stable_mosaic.version = 11 : i64} {
  func.func @_posenc_kernel(%arg0: i32, %arg1: memref<8x16xf32, #tpu.memory_space<vmem>>, %arg2: memref<1x256xf32, #tpu.memory_space<vmem>>, %arg3: memref<1x256xf32, #tpu.memory_space<vmem>>, %arg4: memref<16x256xf32, #tpu.memory_space<vmem>>, %arg5: memref<8x256xf32, #tpu.memory_space<vmem>>) attributes {dimension_semantics = [#tpu.dimension_semantics<parallel>], iteration_bounds = array<i64: 2>, scalar_prefetch = 0 : i64, scratch_operands = 0 : i64, tpu.core_type = #tpu.core_type<tc>, window_params = [{transform_indices = @transform_0, window_bounds = array<i64: 8, 16>}, {pipeline_mode = #tpu.pipeline_mode<synchronous>, transform_indices = @transform_1, window_bounds = array<i64: 1, 256>}, {pipeline_mode = #tpu.pipeline_mode<synchronous>, transform_indices = @transform_2, window_bounds = array<i64: 1, 256>}, {pipeline_mode = #tpu.pipeline_mode<synchronous>, transform_indices = @transform_3, window_bounds = array<i64: 16, 256>}, {transform_indices = @transform_4, window_bounds = array<i64: 8, 256>}]} {
    %c0 = arith.constant 0 : index
    %c0_0 = arith.constant 0 : index
    %0 = vector.load %arg1[%c0, %c0_0] : memref<8x16xf32, #tpu.memory_space<vmem>>, vector<8x16xf32>
    %1 = math.absf %0 : vector<8x16xf32>
    %cst = arith.constant 4.000000e+00 : f32
    %2 = vector.broadcast %cst : f32 to vector<8x16xf32>
    %3 = arith.cmpf ogt, %1, %2 : vector<8x16xf32>
    %cst_1 = arith.constant 0.000000e+00 : f32
    %4 = vector.broadcast %cst_1 : f32 to vector<8x16xf32>
    %5 = arith.select %3, %4, %0 : vector<8x16xi1>, vector<8x16xf32>
    %c0_2 = arith.constant 0 : index
    %c0_3 = arith.constant 0 : index
    %6 = vector.load %arg4[%c0_2, %c0_3] : memref<16x256xf32, #tpu.memory_space<vmem>>, vector<16x256xf32>
    %cst_4 = arith.constant dense<0.000000e+00> : vector<8x256xf32>
    %7 = tpu.matmul %5, %6, %cst_4 {dimension_numbers = #tpu.dot_dimension_numbers<[1], [0], [0], [1], [0, 0, 1, 1], [], []>} : vector<8x16xf32>, vector<16x256xf32>, vector<8x256xf32> -> vector<8x256xf32>
    %c0_5 = arith.constant 0 : index
    %c0_6 = arith.constant 0 : index
    %8 = vector.load %arg2[%c0_5, %c0_6] : memref<1x256xf32, #tpu.memory_space<vmem>>, vector<1x256xf32>
    %9 = vector.broadcast %8 : vector<1x256xf32> to vector<8x256xf32>
    %10 = arith.mulf %7, %9 : vector<8x256xf32>
    %c0_7 = arith.constant 0 : index
    %c0_8 = arith.constant 0 : index
    %11 = vector.load %arg3[%c0_7, %c0_8] : memref<1x256xf32, #tpu.memory_space<vmem>>, vector<1x256xf32>
    %12 = vector.broadcast %11 : vector<1x256xf32> to vector<8x256xf32>
    %13 = arith.addf %10, %12 : vector<8x256xf32>
    %14 = math.sin %13 : vector<8x256xf32>
    %cst_9 = arith.constant 0.000000e+00 : f32
    %15 = vector.broadcast %cst_9 : f32 to vector<8x256xf32>
    %16 = arith.cmpf one, %7, %15 : vector<8x256xf32>
    %cst_10 = arith.constant 0.000000e+00 : f32
    %17 = vector.broadcast %cst_10 : f32 to vector<8x256xf32>
    %18 = arith.select %16, %14, %17 : vector<8x256xi1>, vector<8x256xf32>
    %c0_11 = arith.constant 0 : index
    %c0_12 = arith.constant 0 : index
    %19 = vector.load %arg5[%c0_11, %c0_12] : memref<8x256xf32, #tpu.memory_space<vmem>>, vector<8x256xf32>
    tpu.vector_store %arg5[%c0_11, %c0_12], %18 {strides = array<i32>} : memref<8x256xf32, #tpu.memory_space<vmem>>, vector<8x256xf32>,
    return
  }
  func.func @transform_0(%arg0: i32) -> (i32, i32) {
    %c0_i32 = arith.constant 0 : i32
    %c0_i32_0 = arith.constant 0 : i32
    return %arg0, %c0_i32 : i32, i32
  }
  func.func @transform_1(%arg0: i32) -> (i32, i32) {
    %c0_i32 = arith.constant 0 : i32
    %c0_i32_0 = arith.constant 0 : i32
    %c0_i32_1 = arith.constant 0 : i32
    return %c0_i32, %c0_i32_0 : i32, i32
  }
  func.func @transform_2(%arg0: i32) -> (i32, i32) {
    %c0_i32 = arith.constant 0 : i32
    %c0_i32_0 = arith.constant 0 : i32
    %c0_i32_1 = arith.constant 0 : i32
    return %c0_i32, %c0_i32_0 : i32, i32
  }
  func.func @transform_3(%arg0: i32) -> (i32, i32) {
    %c0_i32 = arith.constant 0 : i32
    %c0_i32_0 = arith.constant 0 : i32
    %c0_i32_1 = arith.constant 0 : i32
    return %c0_i32, %c0_i32_0 : i32, i32
  }
  func.func @transform_4(%arg0: i32) -> (i32, i32) {
    %c0_i32 = arith.constant 0 : i32
    %c0_i32_0 = arith.constant 0 : i32
    return %arg0, %c0_i32 : i32, i32
  }
}

</mosaic_0001>

<bundles_post_ra>
// kernel: tpu_custom_call.1
= control target key start
LH: loop header
LB: loop body
LE: loop exit
PB: predicated region body
PF: predicated region fallthrough
CT: control target
= control target key end

     0   :  { %9 = vsyncpa [#allocation3], 0  ;;  %s1207_s0 = inlined_call_operand.hbm [shape: f32[16,16], index: 0, kind: input, shape index: {}]   ;;  %s1208_s1 = inlined_call_operand.vmem [shape: f32[1,256], index: 1, kind: input, shape index: {}]   ;;  %s1209_s2 = inlined_call_operand.vmem [shape: f32[1,256], index: 2, kind: input, shape index: {}]   ;;  %s1210_s3 = inlined_call_operand.hbm [shape: f32[16,256], index: 3, kind: input, shape index: {}]   ;;  %s1211_s4 = inlined_call_operand.hbm [shape: f32[16,256], index: 4, kind: output, shape index: {}]  }
   0x1   :  { %11 = vsyncpa [#allocation3 + $0x1], 0 }
   0x2   :  { %12 = vsyncpa [#allocation6], 0 }
   0x3   :  { %13 = vsyncpa [#allocation4], 0 }
   0x4   :  { %15 = vsyncpa [#allocation4 + $0x1], 0  ;;  %s926_s15 = smov 0   ;;  %s928_s16 = smov 0  }
   0x5   :  { %s930_s17 = smov 0   ;;  %s932_s18 = smov 0  }
   0x6 LB: > { %s947_s19 = sadd.s32 4294967295, %s887_s18   ;;  %s648_s20 = sadd.s32 4294967294, %s887_s18   ;;  %s887_s18 = sphi %s932_s18, %s1233_s18   ;;  %s883_s17 = sphi %s930_s17, %s1232_s17   ;;  %s879_s16 = sphi %s928_s16, %s1231_s16   ;;  %s875_s15 = sphi %s926_s15, %s1230_s15  }
   0x7   : > { %p41_p0 = scmp.ne.s32.totalorder %s879_s16, %s875_s15  ;;  %p1212_p1 = scmp.eq.s32.totalorder %s947_s19, 0 }
   0x8   : > { %p134_p3 = scmp.eq.s32.totalorder %s648_s20, 1  ;;  %p649_p5 = scmp.ge.s32.totalorder %s887_s18, 1 }
   0x9   : > { %p956_p4 = por %p1212_p1, %p41_p0  ;;  %p141_p7 = scmp.lt.s32.totalorder %s887_s18, 3 }
   0xa   : > { %p961_p6 = por %p134_p3, %p41_p0  ;;  %s889_s24 = smov [#allocation5]  }
   0xb   : > { %s1215_s21 = scalar_select %p956_p4, 1, 0 }
   0xc   : > { %s1216_s22 = scalar_select %p961_p6, 1, 0 }
   0xd   : > { %p966_p8 = pnand %p649_p5, %p141_p7  ;;  %s159_s25 = sshll.u32 %s889_s24, 4  ;;  %s970_s25 = int_to_ptr.vmem [resolvable:$true] %s159_s25 }
   0xe   : > { %s982_s27 = sadd.s32 1, %s887_s18   ;;  %s28_s28 = sadd.s32 1, %s883_s17 }
   0xf   : > { %s1217_s23 = scalar_select %p966_p8, 1, 0 }
  0x10   : > { %p693_p9 = pneg %p966_p8  ;;  %s25_s29 = ssub.s32 %s887_s18, %s982_s27 }
  0x11   : > { %s759_s6 = scalar_lea.hbm %s1210_s3, 512 }
  0x12   : > { %p977_p11 = pnand %p693_p9, %p1212_p1  ;;  %p760_p12 = scmp.ne.s32.totalorder %s1210_s3, %s759_s6 }
  0x13   : > { %p766_p5 = scmp.lt.u32.totalorder %s759_s6, %s1210_s3 }
  0x14   : > { %p761_p13 = pneg %p977_p11 }
  0x16   : > { %p762_p0 = pnand %p761_p13, %p760_p12 }
  0x18   : > { %p763_p3 = pneg %p762_p0 }
  0x1a   : > { %p768_p7 = pnand %p766_p5, %p763_p3 }
  0x1c   : > { %771 = shalt.err (!%p768_p7)
}
  0x1d   : > { %s772_s11 = scalar_lea.vmem %s970_s25, 512  ;;  %p780_p2 = scmp.lt.s32.totalorder %s970_s25, %s970_s25 }
  0x1e   : > { %p773_p9 = scmp.ne.s32.totalorder %s970_s25, %s772_s11  ;;  %p781_p6 = scmp.lt.s32.totalorder %s772_s11, %s772_s11 }
  0x20   : > { %p775_p10 = pnand %p773_p9, %p761_p13  ;;  %p782_p4 = por %p781_p6, %p780_p2 }
  0x22   : > { %p776_p1 = pneg %p775_p10 }
  0x24   : > { %p783_p8 = pnand %p782_p4, %p776_p1 }
  0x26   : > { %786 = shalt.err (!%p783_p8)
}
  0x27   : > { %s890_s12 = smov 256   ;;  %s891_s13 = smov 16  }
  0x28   : > { %696 = dma.hbm_to_vmem [thread:$0]  (!%p977_p11), %s1210_s3, 512, %s970_s25, [#allocation6], %s890_s12, %s890_s12, %s891_s13  }
  0x29   : > { %p26_p2 = scmp.eq.s32.totalorder %s25_s29, 0  ;;  %p35_p1 = scmp.ne.s32.totalorder %s883_s17, %s879_s16 }
  0x2a   : > { %p36_p4 = scmp.eq.s32.totalorder %s887_s18, 0  ;;  %p706_p6 = scmp.lt.s32.totalorder %s887_s18, 2 }
  0x2b   : > { %s1013_s24 = scalar_select %p26_p2, %s883_s17, %s28_s28  }
  0x2c   : > { %p37_p8 = por %p36_p4, %p35_p1  ;;  %p1219_p10 = scmp.eq.s32.totalorder %s947_s19, 1 }
  0x2d   : > { %s173_s5 = sand.u32 1, %s883_s17   ;;  %s653_s6 = sshll.u32 %s887_s18, 7 }
  0x2e   : > { %p1017_p12 = por %p1219_p10, %p35_p1  ;;  %s652_s7 = sshll.u32 %s173_s5, 3 }
  0x2f   : > { %s1026_s9 = scalar_lea.hbm %s1207_s0, %s653_s6  ;;  %s177_s25 = scalar_lea.vmem [#allocation2], %s652_s7 }
  0x30   : > { %s184_s28 = sshll.u32 %s177_s25, 4  ;;  %p1028_p11 = pnand %p706_p6, %p37_p8  ;;  %s1032_s28 = int_to_ptr.vmem [resolvable:$true] %s184_s28 }
  0x31   : > { %s174_s10 = scalar_lea.sflag [#allocation3], %s173_s5  ;;  %s787_s11 = scalar_lea.hbm %s1026_s9, 128 }
  0x32   : > { %p788_p13 = scmp.ne.s32.totalorder %s1026_s9, %s787_s11  ;;  %p789_p0 = pneg %p1028_p11 }
  0x33   : > { %s792_s14 = scalar_lea.hbm %s1207_s0, 256  ;;  %p793_p7 = scmp.lt.u32.totalorder %s1026_s9, %s1207_s0 }
  0x34   : > { %p790_p3 = pnand %p789_p0, %p788_p13  ;;  %p794_p9 = scmp.lt.u32.totalorder %s792_s14, %s787_s11 }
  0x35   : > { %p796_p1 = scmp.lt.u32.totalorder %s787_s11, %s1026_s9 }
  0x36   : > { %p791_p5 = pneg %p790_p3  ;;  %p795_p2 = por %p794_p9, %p793_p7 }
  0x38   : > { %p797_p4 = por %p796_p1, %p795_p2 }
  0x3a   : > { %p798_p6 = pnand %p797_p4, %p791_p5 }
  0x3c   : > { %801 = shalt.err (!%p798_p6)
}
  0x3d   : > { %s802_s5 = scalar_lea.vmem %s1032_s28, 128  ;;  %s892_s7 = smov [#allocation2]  }
  0x3e   : > { %p803_p8 = scmp.ne.s32.totalorder %s1032_s28, %s802_s5  ;;  %s807_s26 = sshll.u32 %s892_s7, 4  ;;  %s808_s26 = int_to_ptr.vmem [resolvable:$false] %s807_s26 }
  0x3f   : > { %s809_s8 = scalar_lea.vmem %s808_s26, 256  ;;  %p810_p3 = scmp.lt.s32.totalorder %s1032_s28, %s808_s26 }
  0x40   : > { %p805_p10 = pnand %p803_p8, %p789_p0  ;;  %p811_p7 = scmp.lt.s32.totalorder %s809_s8, %s802_s5 }
  0x42   : > { %p806_p13 = pneg %p805_p10  ;;  %p812_p9 = por %p811_p7, %p810_p3 }
  0x44   : > { %p813_p2 = pnand %p812_p9, %p806_p13 }
  0x46   : > { %816 = shalt.err (!%p813_p2)
}
  0x47   : > { %700 = dma.hbm_to_vmem [thread:$0]  (!%p1028_p11), %s1026_s9, 128, %s1032_s28, %s174_s10  }
  0x48   : > { %p1222_p5 = scmp.ne.s32.totalorder %s1217_s23, 0 }
  0x49   : > { %s1062_s25 = sand.u32 (!%p1222_p5), 1, %s879_s16   ;;  %p1223_p0 = scmp.ne.s32.totalorder (!%p1222_p5), %s1215_s21, 0 }
  0x4a   : > { %193 = sbr.rel (%p1222_p5) target bundleno = 412 (0x19c), region = 36  ;;  %s655_s11 = sshll.u32 (!%p1222_p5), %s1062_s25, 3 }
  0x4b   : > { %s196_s12 = scalar_lea.sflag (!%p1222_p5), [#allocation3], %s1062_s25  ;;  %s199_s13 = scalar_lea.vmem (!%p1222_p5), [#allocation2], %s655_s11 }
  0x51   : > { %862 = dma.done.wait (%p1223_p0), %s196_s12, 128  }
  0x52   : > { %864 = vsyncadd (%p1223_p0), %s196_s12, 4294967168  ;;  %p1224_p1 = scmp.eq.s32.totalorder %s947_s19, 0 }
  0x54   : > { %866 = dma.done.wait (%p1224_p1), [#allocation6], 512   ;;  %p1225_p11 = pmov %p1224_p1 }
  0x55   : > { %v893_v0 = vmov 0.0   ;;  %v233_v1 = vld [vmem:[#allocation5 + $0x8] sm:$0xff]  ;;  %v235_v2 = vld [vmem:[#allocation5 + $0x18] sm:$0xff]  ;;  %v232_v3 = vld [vmem:[#allocation5] sm:$0xff]  ;;  %vm236_vm1 = vcmask 130048   ;;  %v313_v10 = vlaneseq  ;;  %s657_s29 = sshll.u32 %s1062_s25, 4 }
  0x56   : > { %868 = vsyncadd (%p1225_p11), [#allocation6], 4294966784  ;;  %304 = vmatprep.mubr.f32.mxu0 %v893_v0  ;;  %v673_v4 = vpack.c.bf16 %v235_v2, %v233_v1  ;;  %v234_v5 = vld [vmem:[#allocation5 + $0x10] sm:$0xff]  ;;  %v894_v46 = vmov 683565275   ;;  %s227_s10 = scalar_lea.vmem [#allocation7], %s657_s29 }
  0x57   : > { %v228_v6 = vld [vmem:[%s199_s13] sm:$0xff]  ;;  %v675_v7 = vpack.c.bf16 %v234_v5, %v232_v3  ;;  %v314_v11 = vshrl.u32 %v313_v10, 7  ;;  %v895_v50 = vmov 2475754826   ;;  %v896_v52 = vmov 2131351028  }
  0x58   : > { %v229_v8 = vand.u32 2147483647, %v228_v6  ;;  %674 = vmatprep.subr.bf16.mxu0 %v673_v4  ;;  %v311_v13 = vld [vmem:[%s1208_s1] sm:$0x3]  ;;  %v897_v54 = vmov 2102212464  }
  0x59   : > { %676 = vmatpush1.bf16.msra.mxu0 %v675_v7  ;;  %v315_v12 = vsub.s32 0, %v314_v11  ;;  %v319_v14 = vsub.s32 1, %v314_v11  ;;  %v325_v15 = vld [vmem:[%s1209_s2] sm:$0x3]  ;;  %v898_v56 = vmov 920167782  }
  0x5a   : > { %vm230_vm0 = vcmp.gt.f32.partialorder %v229_v8, 4.0  ;;  %v899_v63 = vmov 1326507024   ;;  %s672_s14 = sshll.u32 %s947_s19, 8  ;;  %s568_s20 = sshll.u32 %s227_s10, 4  ;;  %s1165_s20 = int_to_ptr.vmem [resolvable:$true] %s568_s20 }
  0x5b   : > { %v231_v9 = vsel %vm230_vm0, 0.0, %v228_v6  ;;  %v316_v16 = vrot.slane %v311_v13, %v315_v12  ;;  %v320_v17 = vrot.slane %v311_v13, %v319_v14  ;;  %v330_v18 = vrot.slane %v325_v15, %v315_v12  ;;  %s1163_s7 = scalar_lea.hbm %s1211_s4, %s672_s14  ;;  %s554_s19 = scalar_lea.sflag [#allocation4], %s1062_s25 }
  0x5c   : > { %658 = vmatmul.mubr.msk.f32.vlgmr.msra.gmra.mrb[0].mxu0 %vm236_vm1, %v231_v9  ;;  %v334_v20 = vrot.slane %v325_v15, %v319_v14  ;;  %s817_s26 = scalar_lea.vmem %s1165_s20, 256  ;;  %s900_s8 = smov [#allocation7]  }
  0x5d   : > { %p818_p4 = scmp.ne.s32.totalorder %s1165_s20, %s817_s26  ;;  %s821_s11 = sshll.u32 %s900_s8, 4  ;;  %s822_s11 = int_to_ptr.vmem [resolvable:$false] %s821_s11 }
  0x5e   : > { %s823_s12 = scalar_lea.vmem %s822_s11, 512  ;;  %p824_p10 = scmp.lt.s32.totalorder %s1165_s20, %s822_s11 }
  0x5f   : > { %p819_p6 = pnand %p818_p4, %p1017_p12  ;;  %p825_p13 = scmp.lt.s32.totalorder %s823_s12, %s817_s26 }
  0x61   : > { %p820_p8 = pneg %p819_p6  ;;  %p826_p3 = por %p825_p13, %p824_p10 }
  0x63   : > { %p827_p7 = pnand %p826_p3, %p820_p8 }
 0x12f   : > { %v1080_v19 = vpop.f32.mrb[0].mxu0 }
 0x130   : > { %v323_v21 = vmul.f32 %v316_v16, %v1080_v19  ;;  %v1083_v22 = vpop.f32.mrb[1].mxu0 }
 0x131   : > { %v324_v23 = vmul.f32 %v320_v17, %v1083_v22 }
 0x132   : > { %v1086_v24 = vadd.f32 %v330_v18, %v323_v21 }
 0x133   : > { %v1088_v25 = vadd.f32 %v334_v20, %v324_v23 }
 0x134   : > { %v339_v26 = vand.u32 2147483647, %v1086_v24  ;;  %v342_v27 = vand.u32 2139095040, %v1086_v24  ;;  %vm341_vm0 = vcmp.lt.s32.totalorder %v1086_v24, 0 }
 0x135   : > { %v446_v28 = vand.u32 2139095040, %v1088_v25  ;;  %v443_v31 = vand.u32 2147483647, %v1088_v25 }
 0x136   : > { %v343_v29 = vshrl.u32 %v342_v27, 23  ;;  %v346_v30 = vand.u32 8388607, %v339_v26  ;;  %vm340_vm1 = vcmp.le.f32.partialorder %v339_v26, 0.7853982 }
 0x137   : > { %v447_v32 = vshrl.u32 %v446_v28, 23  ;;  %v1098_v37 = vand.u32 8388607, %v443_v31 }
 0x138   : > { %v659_v33 = vadd.s32 4294967169, %v343_v29  ;;  %v347_v36 = vor.u32 8388608, %v346_v30 }
 0x139   : > { %v663_v34 = vadd.s32 4294967169, %v447_v32  ;;  %v451_v44 = vor.u32 8388608, %v1098_v37 }
 0x13a   : > { %v349_v35 = vadd.s32 1, %v659_v33  ;;  %v1100_v43 = vshll.u32 %v347_v36, 8 }
 0x13b   : > { %v453_v38 = vadd.s32 1, %v663_v34 }
 0x13c   : > { %vm350_vm2 = vcmp.gt.s32.totalorder %v349_v35, 0 }
 0x13d   : > { %v351_v39 = vsel %vm350_vm2, %v349_v35, 0  ;;  %vm454_vm3 = vcmp.gt.s32.totalorder %v453_v38, 0  ;;  %vm445_vm2 = vcmp.lt.s32.totalorder %v1088_v25, 0 }
 0x13e   : > { %v352_v40 = vshrl.u32 %v351_v39, 5  ;;  %v353_v41 = vand.u32 31, %v351_v39  ;;  %v455_v42 = vsel %vm454_vm3, %v453_v38, 0  ;;  %vm1145_vm3 = vcmp.le.f32.partialorder %v443_v31, 0.7853982 }
 0x13f   : > { %v1103_v48 = vshrl.u32 %v455_v42, 5  ;;  %v457_v49 = vand.u32 31, %v455_v42 }
 0x140   : > { %v354_v45 = vsub.s32 32, %v353_v41  ;;  %v356_v47 = vshll.u32 %v894_v46, %v353_v41  ;;  %v359_v51 = vshll.u32 %v895_v50, %v353_v41  ;;  %v362_v53 = vshll.u32 %v896_v52, %v353_v41 }
 0x141   : > { %v365_v55 = vshll.u32 %v897_v54, %v353_v41  ;;  %v368_v57 = vshll.u32 %v898_v56, %v353_v41  ;;  %vm371_vm4 = vcmp.lt.s32.totalorder %v352_v40, 1  ;;  %vm372_vm5 = vcmp.lt.s32.totalorder %v352_v40, 2 }
 0x142   : > { %v357_v58 = vshrl.u32 %v895_v50, %v354_v45  ;;  %v360_v59 = vshrl.u32 %v896_v52, %v354_v45  ;;  %v363_v60 = vshrl.u32 %v897_v54, %v354_v45  ;;  %v355_v61 = vshrl.u32 %v894_v46, %v354_v45 }
 0x143   : > { %v366_v62 = vshrl.u32 %v898_v56, %v354_v45  ;;  %v369_v0 = vshrl.u32 %v899_v63, %v354_v45  ;;  %v458_v4 = vsub.s32 32, %v457_v49  ;;  %vm373_vm6 = vcmp.lt.s32.totalorder %v352_v40, 3 }
 0x144   : > { %v358_v1 = vor.u32 %v357_v58, %v356_v47  ;;  %v361_v2 = vor.u32 %v360_v59, %v359_v51  ;;  %v364_v3 = vor.u32 %v363_v60, %v362_v53  ;;  %vm374_vm7 = vcmp.lt.s32.totalorder %v352_v40, 4 }
 0x145   : > { %v367_v5 = vor.u32 %v366_v62, %v365_v55  ;;  %v370_v6 = vor.u32 %v369_v0, %v368_v57  ;;  %v460_v14 = vshll.u32 %v894_v46, %v457_v49  ;;  %v461_v17 = vshrl.u32 %v895_v50, %v458_v4 }
 0x146   : > { %v375_v7 = vsel %vm371_vm4, %v355_v61, %v358_v1  ;;  %v376_v8 = vsel %vm374_vm7, %v364_v3, 2102212464  ;;  %v379_v9 = vsel %vm371_vm4, %v358_v1, %v361_v2  ;;  %v383_v10 = vsel %vm371_vm4, %v361_v2, %v364_v3 }
 0x147   : > { %v377_v11 = vsel %vm373_vm6, %v361_v2, %v376_v8  ;;  %v380_v12 = vsel %vm374_vm7, %v367_v5, 920167782  ;;  %v384_v13 = vsel %vm374_vm7, %v370_v6, 1326507024  ;;  %v463_v18 = vshll.u32 %v895_v50, %v457_v49 }
 0x148   : > { %v381_v15 = vsel %vm373_vm6, %v364_v3, %v380_v12  ;;  %v385_v16 = vsel %vm373_vm6, %v367_v5, %v384_v13  ;;  %v378_v20 = vsel %vm372_vm5, %v375_v7, %v377_v11  ;;  %v464_v27 = vshrl.u32 %v896_v52, %v458_v4 }
 0x149   : > { %v382_v21 = vsel %vm372_vm5, %v379_v9, %v381_v15  ;;  %v386_v23 = vsel %vm372_vm5, %v383_v10, %v385_v16  ;;  %v462_v33 = vor.u32 %v461_v17, %v460_v14  ;;  %v466_v35 = vshll.u32 %v896_v52, %v457_v49 }
 0x14a   : > { %v1112_v28 = vmul.u32.u64.low %v1100_v43, %v386_v23  ;;  %v1113_v29 = vmul.u32.u64.high %v1100_v43, %v386_v23, %v1112_v28  ;;  %v1116_v30 = vmul.u32.u64.low %v1100_v43, %v382_v21  ;;  %v1117_v32 = vmul.u32.u64.high %v1100_v43, %v382_v21, %v1116_v30 }
 0x14b   : > { %v465_v34 = vor.u32 %v464_v27, %v463_v18  ;;  %v467_v36 = vshrl.u32 %v897_v54, %v458_v4  ;;  %v469_v37 = vshll.u32 %v897_v54, %v457_v49  ;;  %v470_v38 = vshrl.u32 %v898_v56, %v458_v4 }
 0x14c   : > { %v473_v39 = vshrl.u32 %v899_v63, %v458_v4  ;;  %v491_v41 = vshll.u32 %v451_v44, 8  ;;  %v394_v40 = vmul.u32 %v1100_v43, %v378_v20  ;;  %v459_v42 = vshrl.u32 %v894_v46, %v458_v4 }
 0x14d   : > { %v468_v45 = vor.u32 %v467_v36, %v466_v35  ;;  %v472_v47 = vshll.u32 %v898_v56, %v457_v49  ;;  %vm396_vm8 = vc.u32 %v1113_v29, %v1116_v30  ;;  %v397_v50 = vadd.s32 1, %v1117_v32 }
 0x14e   : > { %v471_v51 = vor.u32 %v470_v38, %v469_v37  ;;  %vm475_vm9 = vcmp.lt.s32.totalorder %v1103_v48, 1  ;;  %vm477_vm10 = vcmp.lt.s32.totalorder %v1103_v48, 3  ;;  %vm478_vm11 = vcmp.lt.s32.totalorder %v1103_v48, 4 }
 0x14f   : > { %v474_v53 = vor.u32 %v473_v39, %v472_v47  ;;  %v483_v52 = vsel %vm475_vm9, %v462_v33, %v465_v34  ;;  %v398_v44 = vsel %vm396_vm8, %v397_v50, %v1117_v32  ;;  %v480_v54 = vsel %vm478_vm11, %v468_v45, 2102212464 }
 0x150   : > { %v484_v43 = vsel %vm478_vm11, %v471_v51, 920167782  ;;  %v487_v46 = vsel %vm475_vm9, %v465_v34, %v468_v45  ;;  %v399_v55 = vadd.s32 %v398_v44, %v394_v40  ;;  %vm476_vm12 = vcmp.lt.s32.totalorder %v1103_v48, 2 }
 0x151   : > { %v485_v49 = vsel %vm477_vm10, %v468_v45, %v484_v43  ;;  %v488_v56 = vsel %vm478_vm11, %v474_v53, 1326507024  ;;  %v479_v57 = vsel %vm475_vm9, %v459_v42, %v462_v33  ;;  %v481_v58 = vsel %vm477_vm10, %v465_v34, %v480_v54 }
 0x152   : > { %v486_v59 = vsel %vm476_vm12, %v483_v52, %v485_v49  ;;  %v489_v60 = vsel %vm477_vm10, %v471_v51, %v488_v56  ;;  %v400_v61 = vadd.s32 536870912, %v399_v55  ;;  %v482_v4 = vsel %vm476_vm12, %v479_v57, %v481_v58 }
 0x153   : > { %v490_v62 = vsel %vm476_vm12, %v487_v46, %v489_v60  ;;  %v1127_v63 = vmul.u32.u64.low %v491_v41, %v486_v59  ;;  %v1128_v0 = vmul.u32.u64.high %v491_v41, %v486_v59, %v1127_v63  ;;  %v498_v48 = vmul.u32 %v491_v41, %v482_v4 }
 0x154   : > { %v1130_v1 = vmul.u32.u64.low %v491_v41, %v490_v62  ;;  %v1131_v2 = vmul.u32.u64.high %v491_v41, %v490_v62, %v1130_v1  ;;  %v401_v3 = vshrl.u32 %v400_v61, 30  ;;  %v395_v21 = vadd.s32 %v1116_v30, %v1113_v29 }
 0x155   : > { %v501_v6 = vadd.s32 1, %v1128_v0  ;;  %vm431_vm7 = vweird.f32 %v1086_v24  ;;  %vm547_vm8 = vcmp.ne.f32.partialorder %v1080_v19, 0.0  ;;  %vm535_vm12 = vweird.f32 %v1088_v25 }
 0x156   : > { %v402_v5 = vshll.u32 %v401_v3, 30  ;;  %vm500_vm13 = vc.u32 %v1131_v2, %v1127_v63  ;;  %v499_v45 = vadd.s32 %v1127_v63, %v1131_v2  ;;  %v425_v30 = vsub.s32 4, %v401_v3 }
 0x157   : > { %v502_v8 = vsel %vm500_vm13, %v501_v6, %v1128_v0  ;;  %vm548_vm13 = vcmp.ne.f32.partialorder %v1083_v22, 0.0 }
 0x158   : > { %v403_v7 = vsub.s32 %v399_v55, %v402_v5  ;;  %v503_v9 = vadd.s32 %v502_v8, %v498_v48  ;;  %v426_v55 = vsel %vm341_vm0, %v425_v30, %v401_v3 }
 0x159   : > { %v428_v57 = vsel %vm340_vm1, 0, %v426_v55 }
 0x15a   : > { %v405_v10 = vsub.s32 0, %v403_v7  ;;  %v504_v11 = vadd.s32 536870912, %v503_v9  ;;  %v432_v62 = vadd.s32 3, %v428_v57 }
 0x15c   : > { %v660_v12 = vmin.u32 %v405_v10, %v403_v7  ;;  %v505_v13 = vshrl.u32 %v504_v11, 30  ;;  %v433_v2 = vand.u32 3, %v432_v62 }
 0x15e   : > { %v407_v14 = vclz %v660_v12  ;;  %v506_v15 = vshll.u32 %v505_v13, 30  ;;  %v529_v61 = vsub.s32 4, %v505_v13  ;;  %vm438_vm4 = vcmp.eq.s32.totalorder %v433_v2, 2 }
 0x15f   : > { %vm435_vm5 = vcmp.eq.s32.totalorder %v433_v2, 0  ;;  %vm434_vm6 = vcmp.lt.s32.totalorder %v433_v2, 2 }
 0x160   : > { %v661_v16 = vadd.s32 4294967294, %v407_v14  ;;  %v507_v17 = vsub.s32 %v503_v9, %v506_v15  ;;  %v530_v1 = vsel %vm445_vm2, %v529_v61, %v505_v13 }
 0x161   : > { %v532_v5 = vsel %vm1145_vm3, 0, %v530_v1 }
 0x162   : > { %vm662_vm14 = vcmp.lt.s32.totalorder %v661_v16, 0  ;;  %v509_v20 = vsub.s32 0, %v507_v17  ;;  %v536_v8 = vadd.s32 3, %v532_v5 }
 0x163   : > { %v410_v18 = vsel %vm662_vm14, 0, %v661_v16 }
 0x164   : > { %v411_v23 = vsub.s32 32, %v410_v18  ;;  %v415_v27 = vsub.s32 4294967266, %v410_v18  ;;  %v664_v28 = vmin.u32 %v509_v20, %v507_v17  ;;  %v412_v32 = vshll.u32 %v403_v7, %v410_v18 }
 0x165   : > { %v537_v13 = vand.u32 3, %v536_v8 }
 0x166   : > { %v413_v33 = vshrl.u32 %v395_v21, %v411_v23  ;;  %v416_v34 = vadd.s32 127, %v415_v27  ;;  %v511_v35 = vclz %v664_v28 }
 0x167   : > { %vm542_vm9 = vcmp.eq.s32.totalorder %v537_v13, 2  ;;  %vm539_vm10 = vcmp.eq.s32.totalorder %v537_v13, 0  ;;  %vm538_vm11 = vcmp.lt.s32.totalorder %v537_v13, 2 }
 0x168   : > { %v414_v36 = vor.u32 %v413_v33, %v412_v32  ;;  %v417_v37 = vshll.u32 %v416_v34, 23  ;;  %v665_v38 = vadd.s32 4294967294, %v511_v35 }
 0x16a   : > { %v418_v39 = vor.u32 4788187, %v417_v37  ;;  %vm666_vm15 = vcmp.lt.s32.totalorder %v665_v38, 0  ;;  %v421_v40 = vcvt.s32.f32 %v414_v36 }
 0x16b   : > { %v514_v42 = vsel %vm666_vm15, 0, %v665_v38 }
 0x16c   : > { %v419_v41 = vand.u32 2147483647, %v418_v39  ;;  %v515_v47 = vsub.s32 32, %v514_v42  ;;  %v519_v50 = vsub.s32 4294967266, %v514_v42  ;;  %v516_v51 = vshll.u32 %v507_v17, %v514_v42 }
 0x16e   : > { %v422_v29 = vmul.f32 %v421_v40, %v419_v41  ;;  %v517_v53 = vshrl.u32 %v499_v45, %v515_v47  ;;  %v520_v52 = vadd.s32 127, %v519_v50 }
 0x170   : > { %v423_v44 = vxor.u32 2147483648, %v422_v29  ;;  %v518_v54 = vor.u32 %v517_v53, %v516_v51  ;;  %v521_v43 = vshll.u32 %v520_v52, 23 }
 0x172   : > { %v424_v46 = vsel %vm341_vm0, %v423_v44, %v422_v29  ;;  %v522_v56 = vor.u32 4788187, %v521_v43  ;;  %v525_v59 = vcvt.s32.f32 %v518_v54 }
 0x173   : > { %v427_v49 = vsel %vm340_vm1, %v1086_v24, %v424_v46 }
 0x174   : > { %751 = vcosq.f32 %v427_v49  ;;  %v523_v58 = vand.u32 2147483647, %v522_v56 }
 0x175   : > { %753 = vsinq.f32 %v427_v49 }
 0x176   : > { %v526_v60 = vmul.f32 %v525_v59, %v523_v58 }
 0x178   : > { %v527_v63 = vxor.u32 2147483648, %v526_v60 }
 0x17a   : > { %v528_v0 = vsel %vm445_vm2, %v527_v63, %v526_v60 }
 0x17b   : > { %v531_v3 = vsel %vm1145_vm3, %v1088_v25, %v528_v0 }
 0x17c   : > { %755 = vcosq.f32 %v531_v3 }
 0x17d   : > { %757 = vsinq.f32 %v531_v3 }
 0x17e   : > { %v752_v4 = vpop.eup %751 }
 0x17f   : > { %v754_v6 = vpop.eup %753  ;;  %v439_v48 = vxor.u32 2147483648, %v752_v4 }
 0x180   : > { %v436_v31 = vxor.u32 2147483648, %v754_v6 }
 0x181   : > { %v440_v7 = vsel %vm438_vm4, %v439_v48, %v754_v6 }
 0x182   : > { %v437_v9 = vsel %vm435_vm5, %v752_v4, %v436_v31 }
 0x183   : > { %v441_v10 = vsel %vm434_vm6, %v437_v9, %v440_v7 }
 0x184   : > { %v442_v11 = vsel %vm431_vm7, nan, %v441_v10 }
 0x185   : > { %v549_v12 = vsel %vm547_vm8, %v442_v11, 0.0 }
 0x186   : > { %551 = vst [vmem:[%s227_s10] sm:$0xff] %v549_v12  ;;  %v756_v14 = vpop.eup %755 }
 0x187   : > { %v758_v15 = vpop.eup %757  ;;  %v543_v16 = vxor.u32 2147483648, %v756_v14 }
 0x188   : > { %v540_v17 = vxor.u32 2147483648, %v758_v15 }
 0x189   : > { %v544_v18 = vsel %vm542_vm9, %v543_v16, %v758_v15 }
 0x18a   : > { %v541_v24 = vsel %vm539_vm10, %v756_v14, %v540_v17 }
 0x18b   : > { %v545_v19 = vsel %vm538_vm11, %v541_v24, %v544_v18 }
 0x18c   : > { %v546_v20 = vsel %vm535_vm12, nan, %v545_v19 }
 0x18d   : > { %v550_v21 = vsel %vm548_vm13, %v546_v20, 0.0 }
 0x18e   : > { %552 = vst [vmem:[%s227_s10 + $0x8] sm:$0xff] %v550_v21 }
 0x18f   : > { %830 = shalt.err (!%p827_p7)
}
 0x190   : > { %s831_s25 = scalar_lea.hbm %s1163_s7, 256  ;;  %s835_s23 = scalar_lea.hbm %s1211_s4, 512 }
 0x191   : > { %p832_p9 = scmp.ne.s32.totalorder %s1163_s7, %s831_s25  ;;  %p836_p0 = scmp.lt.u32.totalorder %s1163_s7, %s1211_s4 }
 0x192   : > { %p837_p1 = scmp.lt.u32.totalorder %s835_s23, %s831_s25  ;;  %p839_p4 = scmp.lt.u32.totalorder %s831_s25, %s1163_s7 }
 0x193   : > { %p833_p2 = pnand %p832_p9, %p1017_p12 }
 0x194   : > { %p838_p11 = por %p837_p1, %p836_p0 }
 0x195   : > { %p834_p5 = pneg %p833_p2 }
 0x196   : > { %p840_p6 = por %p839_p4, %p838_p11 }
 0x198   : > { %p841_p8 = pnand %p840_p6, %p834_p5 }
 0x19a   : > { %844 = shalt.err (!%p841_p8)
}
 0x19b   : > { %691 = dma.vmem_to_hbm [thread:$0]  (%p1017_p12), %s1165_s20, 256, %s1163_s7, %s554_s19  }
 0x19c PF: > { %s580_s29 = sand.u32 1, %s875_s15   ;;  %p1228_p10 = scmp.ne.s32.totalorder %s1216_s22, 0 }
 0x19d   : > { %p1229_p13 = scmp.ge.s32.totalorder %s887_s18, 2  ;;  %s581_s10 = scalar_lea.sflag [#allocation4], %s580_s29 }
 0x19f   : > { %p702_p3 = pnand %p1229_p13, %p1228_p10 }
 0x1a1   : > { %870 = dma.done.wait (!%p702_p3), %s581_s10, 256  }
 0x1a2   : > { %872 = vsyncadd (!%p702_p3), %s581_s10, 4294967040  ;;  %p18_p7 = scmp.ge.s32.totalorder %s982_s27, 4   ;;  %s1230_s15 = smov %s879_s16 }
 0x1a3   : > { %s1231_s16 = smov %s883_s17  ;;  %s1232_s17 = smov %s1013_s24 }
 0x1a4   : > { %s1233_s18 = smov %s982_s27  ;;  %20 = sbr.rel (!%p18_p7) target bundleno = 6 (0x6), region = 85 }
 0x1ab   :  { %586 = vsyncpa [#allocation3], 1 }
 0x1ac   :  { %588 = vsyncpa [#allocation3 + $0x1], 1 }
 0x1ad   :  { %589 = vsyncpa [#allocation6], 1 }
 0x1ae   :  { %590 = vsyncpa [#allocation4], 1 }
 0x1af   :  { %592 = vsyncpa [#allocation4 + $0x1], 1 }

</bundles_post_ra>
